<compile_context>
chip_gen: v6e
topology: v6e:2x2x1
jax: 0.10.0
libtpu: 0.0.40
codegen_flags: <defaults>
</compile_context>

<pallas_src>
import math
import functools

import jax
import jax.numpy as jnp
from jax import lax
from jax.experimental import pallas as pl
from jax.experimental.pallas import tpu as pltpu


def _flash_qkv_kernel(q_ref, k_ref, v_ref, o_ref, m_sc, l_sc, acc_sc, *,
                      scale2):
    """One (head-block, q-tile, kv-tile) grid step.

    q_ref: [Hb, C, Tq]   k_ref/v_ref: [Hb, C, Tk]   o_ref: [Hb, C, Tq]
    m_sc/l_sc: [Hb, Tq, 1] f32 (running max / sum)
    acc_sc:    [Hb, Tq, C] f32 (unnormalized output accumulator)
    """
    kv = pl.program_id(2)

    @pl.when(kv == 0)
    def _init():
        m_sc[...] = jnp.full(m_sc.shape, -jnp.inf, dtype=m_sc.dtype)
        l_sc[...] = jnp.zeros(l_sc.shape, dtype=l_sc.dtype)
        acc_sc[...] = jnp.zeros(acc_sc.shape, dtype=acc_sc.dtype)

    q = q_ref[...]                                   # input dtype (no upcast)
    k = k_ref[...]
    v = v_ref[...]

    # logits[h, t, s] = sum_c q[h, c, t] * k[h, c, s]
    # contract C (dim 1 of both), batch Hb -- no transposed operand built.
    s = lax.dot_general(q, k, (((1,), (1,)), ((0,), (0,))),
                        preferred_element_type=jnp.float32)     # [Hb, Tq, Tk]
    s = s * scale2               # fold (1/ch**0.25)**2 into the f32 logits

    # online (flash) softmax over the kv axis, all in f32.
    m_prev = m_sc[...]                                          # [Hb, Tq, 1]
    m_new = jnp.maximum(m_prev, jnp.max(s, axis=-1, keepdims=True))
    p = jnp.exp(s - m_new)                                      # [Hb, Tq, Tk]
    alpha = jnp.exp(m_prev - m_new)                             # [Hb, Tq, 1]
    l_sc[...] = alpha * l_sc[...] + jnp.sum(p, axis=-1, keepdims=True)
    m_sc[...] = m_new

    # acc[h, t, c] += sum_s p[h, t, s] * v[h, c, s]
    # contract Tk (last dim of both), batch Hb -- no transposed operand built.
    pv = lax.dot_general(p.astype(v.dtype), v,
                         (((2,), (2,)), ((0,), (0,))),
                         preferred_element_type=jnp.float32)    # [Hb, Tq, C]
    acc_sc[...] = alpha * acc_sc[...] + pv

    @pl.when(kv == pl.num_programs(2) - 1)
    def _finalize():
        # Normalize the [Hb,Tq,C] accumulator (not the [Tq,Tk] weights) with
        # the EUP reciprocal, then relayout once to the module's channel-major
        # output [Hb, C, Tq] (single small XLU transpose per output tile).
        inv_l = pl.reciprocal(l_sc[...], approx=True)           # [Hb, Tq, 1]
        out_tc = acc_sc[...] * inv_l                            # [Hb, Tq, C]
        o_ref[...] = jnp.swapaxes(out_tc, 1, 2).astype(o_ref.dtype)


def _pick_time_tile(total, target):
    """Largest multiple of 128 that is <= target and divides `total`;
    falls back to the full extent (always a legal block size)."""
    if total <= target:
        return total
    t = (target // 128) * 128
    while t >= 128:
        if total % t == 0:
            return t
        t -= 128
    # TODO(synk): pad/pack T (with -inf key masking) so stores stay lane-dense
    # when T is not a multiple of 128.
    return total


def qkv_attention(qkv, n_heads, *, q_tile=256, kv_tile=512, head_block=None,
                  vmem_limit_bytes=None):
    """Pallas implementation of QKVAttention.forward.

    qkv: [N, H*3*C, T]  ->  [N, H*C, T]
    """
    bs, width, length = qkv.shape
    assert width % (3 * n_heads) == 0
    ch = width // (3 * n_heads)
    scale2 = 1.0 / math.sqrt(ch)        # == (1/ch**0.25)**2, folded post-MXU
    bh = bs * n_heads
    itemsize = jnp.dtype(qkv.dtype).itemsize

    x = qkv.reshape(bh, 3 * ch, length)         # free reshape in plain JAX

    tq = _pick_time_tile(length, q_tile)
    tk = _pick_time_tile(length, kv_tile)
    n_q, n_kv = length // tq, length // tk

    # Heads per grid step: amortize per-step pipeline overhead and feed the
    # MXU, capped so the f32 logits tile stays <= 2 MiB (fits v5e's 16 MiB
    # default scoped VMEM and leaves headroom on v7x's 64 MiB physical VMEM).
    if head_block is None:
        head_block = 1
        for cand in (16, 8, 4, 2, 1):
            if bh % cand == 0 and cand * tq * tk * 4 <= 2 * 1024 * 1024:
                head_block = cand
                break
    hb = head_block
    assert bh % hb == 0, "head_block must divide batch*heads"
    n_bh = bh // hb

    if ch % 8 == 0:
        # Pass the same array three times: channel-block index 0/1/2 selects
        # the q/k/v slice of the head's 3*C channels -> no HBM split copies.
        q_in = k_in = v_in = x
        q_spec = pl.BlockSpec((hb, ch, tq), lambda b, qi, ki: (b, 0, qi))
        k_spec = pl.BlockSpec((hb, ch, tk), lambda b, qi, ki: (b, 1, ki))
        v_spec = pl.BlockSpec((hb, ch, tk), lambda b, qi, ki: (b, 2, ki))
    else:
        # (8,128) rule: a C-sized channel block inside the 3*C axis needs
        # C % 8 == 0; otherwise split in the wrapper so blocks span full C.
        q_in, k_in, v_in = x[:, :ch, :], x[:, ch:2 * ch, :], x[:, 2 * ch:, :]
        q_spec = pl.BlockSpec((hb, ch, tq), lambda b, qi, ki: (b, 0, qi))
        k_spec = pl.BlockSpec((hb, ch, tk), lambda b, qi, ki: (b, 0, ki))
        v_spec = pl.BlockSpec((hb, ch, tk), lambda b, qi, ki: (b, 0, ki))

    out_spec = pl.BlockSpec((hb, ch, tq), lambda b, qi, ki: (b, 0, qi))

    flops = 4 * bh * ch * length * length            # two matmuls
    transcendentals = bh * length * length           # exp
    bytes_accessed = itemsize * bh * ch * length * (1 + 2 * n_q + 1)

    out = pl.pallas_call(
        functools.partial(_flash_qkv_kernel, scale2=scale2),
        out_shape=jax.ShapeDtypeStruct((bh, ch, length), qkv.dtype),
        grid_spec=pltpu.PrefetchScalarGridSpec(
            num_scalar_prefetch=0,
            grid=(n_bh, n_q, n_kv),
            in_specs=[q_spec, k_spec, v_spec],
            out_specs=out_spec,
            scratch_shapes=[
                pltpu.VMEM((hb, tq, 1), jnp.float32),    # running max m
                pltpu.VMEM((hb, tq, 1), jnp.float32),    # running sum l
                pltpu.VMEM((hb, tq, ch), jnp.float32),   # output accumulator
            ]),
        compiler_params=pltpu.CompilerParams(
            dimension_semantics=("parallel", "parallel", "arbitrary"),
            vmem_limit_bytes=vmem_limit_bytes),
        cost_estimate=pl.CostEstimate(
            flops=flops, transcendentals=transcendentals,
            bytes_accessed=bytes_accessed),
    )(q_in, k_in, v_in)

    return out.reshape(bs, n_heads * ch, length)


def _reference(qkv, n_heads):
    """Pure-JAX reference mirroring the PyTorch forward exactly."""
    bs, width, length = qkv.shape
    ch = width // (3 * n_heads)
    scale = 1.0 / math.sqrt(math.sqrt(ch))
    x = qkv.reshape(bs * n_heads, 3 * ch, length)
    q, k, v = x[:, :ch, :], x[:, ch:2 * ch, :], x[:, 2 * ch:, :]
    w = jnp.einsum('bct,bcs->bts', q * scale, k * scale)
    w = jax.nn.softmax(w.astype(jnp.float32), axis=-1).astype(w.dtype)
    out = jnp.einsum('bts,bcs->bct', w, v)
    return out.reshape(bs, -1, length)


if __name__ == "__main__":
    key = jax.random.PRNGKey(0)
    k1, k2 = jax.random.split(key)

    # Tolerance note: the kernel folds scale*scale into the f32 logits after
    # the MXU (instead of pre-scaling q/k), uses flash-style recombination and
    # an approximate EUP reciprocal, and the MXU's default f32 path is itself
    # a multi-pass bf16 algorithm -- all of which change rounding slightly vs.
    # the literal PyTorch op order. Genuine bugs show up as O(1) errors.
    tol = 1e-2

    # config 1: tiny shapes (single tile on every axis): N=2, H=2, C=8, T=16.
    bs, n_heads, ch, length = 2, 2, 8, 16
    qkv1 = jax.random.normal(k1, (bs, n_heads * 3 * ch, length), jnp.float32)
    out1 = jax.block_until_ready(qkv_attention(qkv1, n_heads))
    ref1 = _reference(qkv1, n_heads)
    assert out1.shape == (bs, n_heads * ch, length)
    assert jnp.allclose(out1, ref1, atol=tol, rtol=tol), "config1 mismatch"

    # config 2: exercises head batching + multi-step online softmax
    # (grid = (1, 2, 2)): N=1, H=2, C=64, T=256 with 128-wide time tiles.
    bs, n_heads, ch, length = 1, 2, 64, 256
    qkv2 = jax.random.normal(k2, (bs, n_heads * 3 * ch, length), jnp.float32)
    out2 = jax.block_until_ready(
        qkv_attention(qkv2, n_heads, q_tile=128, kv_tile=128))
    ref2 = _reference(qkv2, n_heads)
    assert out2.shape == (bs, n_heads * ch, length)
    assert jnp.allclose(out2, ref2, atol=tol, rtol=tol), "config2 mismatch"

    print("KERNEL_OK")
</pallas_src>

<mosaic_0001>
module attributes {stable_mosaic.version = 11 : i64} {
  func.func @_flash_qkv_kernel(%arg0: i32, %arg1: i32, %arg2: i32, %arg3: memref<4x8x16xf32, #tpu.memory_space<vmem>>, %arg4: memref<4x8x16xf32, #tpu.memory_space<vmem>>, %arg5: memref<4x8x16xf32, #tpu.memory_space<vmem>>, %arg6: memref<4x8x16xf32, #tpu.memory_space<vmem>>, %arg7: memref<4x16x1xf32, #tpu.memory_space<vmem>>, %arg8: memref<4x16x1xf32, #tpu.memory_space<vmem>>, %arg9: memref<4x16x8xf32, #tpu.memory_space<vmem>>) attributes {dimension_semantics = [#tpu.dimension_semantics<parallel>, #tpu.dimension_semantics<parallel>, #tpu.dimension_semantics<arbitrary>], iteration_bounds = array<i64: 1, 1, 1>, scalar_prefetch = 0 : i64, scratch_operands = 3 : i64, tpu.core_type = #tpu.core_type<tc>, window_params = [{transform_indices = @transform_0, window_bounds = array<i64: 4, 8, 16>}, {transform_indices = @transform_1, window_bounds = array<i64: 4, 8, 16>}, {transform_indices = @transform_2, window_bounds = array<i64: 4, 8, 16>}, {transform_indices = @transform_3, window_bounds = array<i64: 4, 8, 16>}]} {
    %c0_i32 = arith.constant 0 : i32
    %0 = arith.cmpi eq, %arg2, %c0_i32 : i32
    %1 = arith.extui %0 : i1 to i32
    %c0_i32_0 = arith.constant 0 : i32
    %2 = arith.cmpi ne, %1, %c0_i32_0 : i32
    scf.if %2 {
      %cst_33 = arith.constant 0xFF800000 : f32
      %34 = vector.broadcast %cst_33 : f32 to vector<4x16x1xf32>
      %c0_34 = arith.constant 0 : index
      %c0_35 = arith.constant 0 : index
      %c0_36 = arith.constant 0 : index
      %35 = vector.load %arg7[%c0_34, %c0_35, %c0_36] : memref<4x16x1xf32, #tpu.memory_space<vmem>>, vector<4x16x1xf32>
      tpu.vector_store %arg7[%c0_34, %c0_35, %c0_36], %34 {strides = array<i32>} : memref<4x16x1xf32, #tpu.memory_space<vmem>>, vector<4x16x1xf32>,
      %cst_37 = arith.constant 0.000000e+00 : f32
      %36 = vector.broadcast %cst_37 : f32 to vector<4x16x1xf32>
      %c0_38 = arith.constant 0 : index
      %c0_39 = arith.constant 0 : index
      %c0_40 = arith.constant 0 : index
      %37 = vector.load %arg8[%c0_38, %c0_39, %c0_40] : memref<4x16x1xf32, #tpu.memory_space<vmem>>, vector<4x16x1xf32>
      tpu.vector_store %arg8[%c0_38, %c0_39, %c0_40], %36 {strides = array<i32>} : memref<4x16x1xf32, #tpu.memory_space<vmem>>, vector<4x16x1xf32>,
      %cst_41 = arith.constant 0.000000e+00 : f32
      %38 = vector.broadcast %cst_41 : f32 to vector<4x16x8xf32>
      %c0_42 = arith.constant 0 : index
      %c0_43 = arith.constant 0 : index
      %c0_44 = arith.constant 0 : index
      %39 = vector.load %arg9[%c0_42, %c0_43, %c0_44] : memref<4x16x8xf32, #tpu.memory_space<vmem>>, vector<4x16x8xf32>
      tpu.vector_store %arg9[%c0_42, %c0_43, %c0_44], %38 {strides = array<i32>} : memref<4x16x8xf32, #tpu.memory_space<vmem>>, vector<4x16x8xf32>,
    } else {
    }
    %c0 = arith.constant 0 : index
    %c0_1 = arith.constant 0 : index
    %c0_2 = arith.constant 0 : index
    %3 = vector.load %arg3[%c0, %c0_1, %c0_2] : memref<4x8x16xf32, #tpu.memory_space<vmem>>, vector<4x8x16xf32>
    %c0_3 = arith.constant 0 : index
    %c0_4 = arith.constant 0 : index
    %c0_5 = arith.constant 0 : index
    %4 = vector.load %arg4[%c0_3, %c0_4, %c0_5] : memref<4x8x16xf32, #tpu.memory_space<vmem>>, vector<4x8x16xf32>
    %c0_6 = arith.constant 0 : index
    %c0_7 = arith.constant 0 : index
    %c0_8 = arith.constant 0 : index
    %5 = vector.load %arg5[%c0_6, %c0_7, %c0_8] : memref<4x8x16xf32, #tpu.memory_space<vmem>>, vector<4x8x16xf32>
    %cst = arith.constant dense<0.000000e+00> : vector<4x16x16xf32>
    %6 = tpu.matmul %3, %4, %cst {dimension_numbers = #tpu.dot_dimension_numbers<[1], [1], [2], [2], [0, 0, 0, 2, 1, 2], [0], [0]>} : vector<4x8x16xf32>, vector<4x8x16xf32>, vector<4x16x16xf32> -> vector<4x16x16xf32>
    %cst_9 = arith.constant 0.353553385 : f32
    %7 = vector.broadcast %cst_9 : f32 to vector<4x16x16xf32>
    %8 = arith.mulf %6, %7 : vector<4x16x16xf32>
    %c0_10 = arith.constant 0 : index
    %c0_11 = arith.constant 0 : index
    %c0_12 = arith.constant 0 : index
    %9 = vector.load %arg7[%c0_10, %c0_11, %c0_12] : memref<4x16x1xf32, #tpu.memory_space<vmem>>, vector<4x16x1xf32>
    %cst_13 = arith.constant dense<0xFF800000> : vector<4x16xf32>
    %10 = vector.multi_reduction <maximumf>, %8, %cst_13 [2] : vector<4x16x16xf32> to vector<4x16xf32>
    %11 = vector.shape_cast %10 : vector<4x16xf32> to vector<4x16x1xf32>
    %12 = arith.maximumf %9, %11 : vector<4x16x1xf32>
    %13 = vector.broadcast %12 : vector<4x16x1xf32> to vector<4x16x16xf32>
    %14 = arith.subf %8, %13 : vector<4x16x16xf32>
    %15 = math.exp %14 : vector<4x16x16xf32>
    %16 = arith.subf %9, %12 : vector<4x16x1xf32>
    %17 = math.exp %16 : vector<4x16x1xf32>
    %c0_14 = arith.constant 0 : index
    %c0_15 = arith.constant 0 : index
    %c0_16 = arith.constant 0 : index
    %18 = vector.load %arg8[%c0_14, %c0_15, %c0_16] : memref<4x16x1xf32, #tpu.memory_space<vmem>>, vector<4x16x1xf32>
    %19 = arith.mulf %17, %18 : vector<4x16x1xf32>
    %cst_17 = arith.constant dense<0.000000e+00> : vector<4x16xf32>
    %20 = vector.multi_reduction <add>, %15, %cst_17 [2] : vector<4x16x16xf32> to vector<4x16xf32>
    %21 = vector.shape_cast %20 : vector<4x16xf32> to vector<4x16x1xf32>
    %22 = arith.addf %19, %21 : vector<4x16x1xf32>
    %c0_18 = arith.constant 0 : index
    %c0_19 = arith.constant 0 : index
    %c0_20 = arith.constant 0 : index
    %23 = vector.load %arg8[%c0_18, %c0_19, %c0_20] : memref<4x16x1xf32, #tpu.memory_space<vmem>>, vector<4x16x1xf32>
    tpu.vector_store %arg8[%c0_18, %c0_19, %c0_20], %22 {strides = array<i32>} : memref<4x16x1xf32, #tpu.memory_space<vmem>>, vector<4x16x1xf32>,
    %c0_21 = arith.constant 0 : index
    %c0_22 = arith.constant 0 : index
    %c0_23 = arith.constant 0 : index
    %24 = vector.load %arg7[%c0_21, %c0_22, %c0_23] : memref<4x16x1xf32, #tpu.memory_space<vmem>>, vector<4x16x1xf32>
    tpu.vector_store %arg7[%c0_21, %c0_22, %c0_23], %12 {strides = array<i32>} : memref<4x16x1xf32, #tpu.memory_space<vmem>>, vector<4x16x1xf32>,
    %cst_24 = arith.constant dense<0.000000e+00> : vector<4x16x8xf32>
    %25 = tpu.matmul %15, %5, %cst_24 {dimension_numbers = #tpu.dot_dimension_numbers<[2], [2], [1], [1], [0, 0, 0, 1, 1, 1], [0], [0]>} : vector<4x16x16xf32>, vector<4x8x16xf32>, vector<4x16x8xf32> -> vector<4x16x8xf32>
    %c0_25 = arith.constant 0 : index
    %c0_26 = arith.constant 0 : index
    %c0_27 = arith.constant 0 : index
    %26 = vector.load %arg9[%c0_25, %c0_26, %c0_27] : memref<4x16x8xf32, #tpu.memory_space<vmem>>, vector<4x16x8xf32>
    %27 = vector.broadcast %17 : vector<4x16x1xf32> to vector<4x16x8xf32>
    %28 = arith.mulf %27, %26 : vector<4x16x8xf32>
    %29 = arith.addf %28, %25 : vector<4x16x8xf32>
    %c0_28 = arith.constant 0 : index
    %c0_29 = arith.constant 0 : index
    %c0_30 = arith.constant 0 : index
    %30 = vector.load %arg9[%c0_28, %c0_29, %c0_30] : memref<4x16x8xf32, #tpu.memory_space<vmem>>, vector<4x16x8xf32>
    tpu.vector_store %arg9[%c0_28, %c0_29, %c0_30], %29 {strides = array<i32>} : memref<4x16x8xf32, #tpu.memory_space<vmem>>, vector<4x16x8xf32>,
    %c0_i32_31 = arith.constant 0 : i32
    %31 = arith.cmpi eq, %arg2, %c0_i32_31 : i32
    %32 = arith.extui %31 : i1 to i32
    %c0_i32_32 = arith.constant 0 : i32
    %33 = arith.cmpi ne, %32, %c0_i32_32 : i32
    scf.if %33 {
      %c0_33 = arith.constant 0 : index
      %c0_34 = arith.constant 0 : index
      %c0_35 = arith.constant 0 : index
      %34 = vector.load %arg8[%c0_33, %c0_34, %c0_35] : memref<4x16x1xf32, #tpu.memory_space<vmem>>, vector<4x16x1xf32>
      %35 = tpu.reciprocal %34 {approx = true} : vector<4x16x1xf32> -> vector<4x16x1xf32>
      %c0_36 = arith.constant 0 : index
      %c0_37 = arith.constant 0 : index
      %c0_38 = arith.constant 0 : index
      %36 = vector.load %arg9[%c0_36, %c0_37, %c0_38] : memref<4x16x8xf32, #tpu.memory_space<vmem>>, vector<4x16x8xf32>
      %37 = vector.broadcast %35 : vector<4x16x1xf32> to vector<4x16x8xf32>
      %38 = arith.mulf %36, %37 : vector<4x16x8xf32>
      %39 = tpu.transpose %38, [0, 2, 1] : vector<4x16x8xf32> -> vector<4x8x16xf32>
      %c0_39 = arith.constant 0 : index
      %c0_40 = arith.constant 0 : index
      %c0_41 = arith.constant 0 : index
      %40 = vector.load %arg6[%c0_39, %c0_40, %c0_41] : memref<4x8x16xf32, #tpu.memory_space<vmem>>, vector<4x8x16xf32>
      tpu.vector_store %arg6[%c0_39, %c0_40, %c0_41], %39 {strides = array<i32>} : memref<4x8x16xf32, #tpu.memory_space<vmem>>, vector<4x8x16xf32>,
    } else {
    }
    return
  }
  func.func @transform_0(%arg0: i32, %arg1: i32, %arg2: i32) -> (i32, i32, i32) {
    %c0_i32 = arith.constant 0 : i32
    %c0_i32_0 = arith.constant 0 : i32
    return %arg0, %c0_i32, %arg1 : i32, i32, i32
  }
  func.func @transform_1(%arg0: i32, %arg1: i32, %arg2: i32) -> (i32, i32, i32) {
    %c1_i32 = arith.constant 1 : i32
    %c0_i32 = arith.constant 0 : i32
    return %arg0, %c1_i32, %arg2 : i32, i32, i32
  }
  func.func @transform_2(%arg0: i32, %arg1: i32, %arg2: i32) -> (i32, i32, i32) {
    %c2_i32 = arith.constant 2 : i32
    %c0_i32 = arith.constant 0 : i32
    return %arg0, %c2_i32, %arg2 : i32, i32, i32
  }
  func.func @transform_3(%arg0: i32, %arg1: i32, %arg2: i32) -> (i32, i32, i32) {
    %c0_i32 = arith.constant 0 : i32
    %c0_i32_0 = arith.constant 0 : i32
    return %arg0, %c0_i32, %arg1 : i32, i32, i32
  }
}

</mosaic_0001>

<bundles_post_ra>
// kernel: tpu_custom_call.1
= control target key start
LH: loop header
LB: loop body
LE: loop exit
PB: predicated region body
PF: predicated region fallthrough
CT: control target
= control target key end

     0   :  { %s1953_s0 = inlined_call_operand.vmem [shape: f32[4,24,16], index: 0, kind: input, shape index: {}]   ;;  %s1954_s1 = inlined_call_operand.vmem [shape: f32[4,24,16], index: 1, kind: input, shape index: {}]   ;;  %s1955_s2 = inlined_call_operand.vmem [shape: f32[4,24,16], index: 2, kind: input, shape index: {}]   ;;  %s1956_s3 = inlined_call_operand.hbm [shape: f32[4,8,16], index: 3, kind: output, shape index: {}]  }
   0x1   :  { %v45_v0 = vld [vmem:[%s1953_s0] sm:$0xff]  ;;  %v49_v1 = vld [vmem:[%s1953_s0 + $0x30] sm:$0xff]  ;;  %v1498_v2 = vld [vmem:[%s1954_s1 + $0x8] sm:$0xff] }
   0x2   :  { %200 = vxpose.xlu0.b32.start.end [1/1] (short) (narrow) %v45_v0, 16  ;;  %427 = vxpose.xlu1.b32.start.end [1/1] (short) (narrow) %v49_v1, 16 }
   0x3   :  { %8 = vsyncpa [#allocation9], 0  ;;  %1550 = vmatprep.subr.mxu0 %v1498_v2  ;;  %v1500_v3 = vld [vmem:[%s1954_s1 + $0x38] sm:$0xff]  ;;  %v51_v5 = vld [vmem:[%s1953_s0 + $0x48] sm:$0xff]  ;;  %vm179_vm0 = vcmask 64512   ;;  %vm162_vm1 = vcmask 7168  }
   0x4   :  { %v47_v4 = vld [vmem:[%s1953_s0 + $0x18] sm:$0xff]  ;;  %1551 = vmatpush3.msra.mxu0 %v1498_v2  ;;  %v1499_v6 = vld [vmem:[%s1954_s1 + $0x20] sm:$0xff]  ;;  %v1501_v7 = vld [vmem:[%s1954_s1 + $0x50] sm:$0xff]  ;;  %v1668_v16 = vmov -inf   ;;  %vm669_vm2 = vcmask 130048   ;;  %v1669_v38 = vmov 0  }
   0x5   :  { %1560 = vmatprep.subr.mxu0 %v1500_v3  ;;  %1555 = vmatprep.subr.mxu1 %v1499_v6  ;;  %164 = vst.msk [vmem:[#allocation2 + $0x8] sm:$0xff] %vm162_vm1, %v1668_v16  ;;  %163 = vst.msk [vmem:[#allocation2] sm:$0xff] %vm162_vm1, %v1668_v16  ;;  %v1670_v42 = vmov 0.0  }
   0x6   :  { %1556 = vmatpush3.msra.mxu1 %v1499_v6  ;;  %165 = vst.msk [vmem:[#allocation2 + $0x10] sm:$0xff] %vm162_vm1, %v1668_v16  ;;  %166 = vst.msk [vmem:[#allocation2 + $0x18] sm:$0xff] %vm162_vm1, %v1668_v16 }
   0x7   :  { %314 = vxpose.xlu0.b32.start.end [1/1] (short) (narrow) %v47_v4, 16  ;;  %540 = vxpose.xlu1.b32.start.end [1/1] (short) (narrow) %v51_v5, 16  ;;  %167 = vst.msk [vmem:[#allocation2 + $0x20] sm:$0xff] %vm162_vm1, %v1668_v16  ;;  %168 = vst.msk [vmem:[#allocation2 + $0x28] sm:$0xff] %vm162_vm1, %v1668_v16  ;;  %v1502_v4 = vld [vmem:[%s1955_s2 + $0x10] sm:$0xff] }
   0x8   :  { %1565 = vmatprep.subr.mxu1 %v1501_v7  ;;  %169 = vst.msk [vmem:[#allocation2 + $0x30] sm:$0xff] %vm162_vm1, %v1668_v16  ;;  %170 = vst.msk [vmem:[#allocation2 + $0x38] sm:$0xff] %vm162_vm1, %v1668_v16 }
   0x9   :  { %172 = vst.msk [vmem:[#allocation3 + $0x8] sm:$0xff] %vm162_vm1, %v1670_v42  ;;  %171 = vst.msk [vmem:[#allocation3] sm:$0xff] %vm162_vm1, %v1670_v42 }
   0xa   :  { %173 = vst.msk [vmem:[#allocation3 + $0x10] sm:$0xff] %vm162_vm1, %v1670_v42  ;;  %174 = vst.msk [vmem:[#allocation3 + $0x18] sm:$0xff] %vm162_vm1, %v1670_v42 }
   0xb   :  { %175 = vst.msk [vmem:[#allocation3 + $0x20] sm:$0xff] %vm162_vm1, %v1670_v42  ;;  %176 = vst.msk [vmem:[#allocation3 + $0x28] sm:$0xff] %vm162_vm1, %v1670_v42 }
   0xc   :  { %177 = vst.msk [vmem:[#allocation3 + $0x30] sm:$0xff] %vm162_vm1, %v1670_v42  ;;  %178 = vst.msk [vmem:[#allocation3 + $0x38] sm:$0xff] %vm162_vm1, %v1670_v42  ;;  %v1782_v43 = vld [vmem:[#allocation2 + $0x8] sm:$0xff]  ;;  %v1784_v45 = vld [vmem:[#allocation2] sm:$0xff] }
   0xd   :  { %180 = vst.msk [vmem:[#allocation4] sm:$0xff] %vm179_vm0, %v1670_v42  ;;  %181 = vst.msk [vmem:[#allocation4 + $0x8] sm:$0xff] %vm179_vm0, %v1670_v42  ;;  %v1804_v53 = vld [vmem:[#allocation2 + $0x18] sm:$0xff]  ;;  %v1818_v60 = vld [vmem:[#allocation2 + $0x10] sm:$0xff] }
   0xe   :  { %182 = vst.msk [vmem:[#allocation4 + $0x10] sm:$0xff] %vm179_vm0, %v1670_v42  ;;  %183 = vst.msk [vmem:[#allocation4 + $0x18] sm:$0xff] %vm179_vm0, %v1670_v42  ;;  %v1797_v50 = vld [vmem:[#allocation2 + $0x20] sm:$0xff]  ;;  %v1809_v56 = vld [vmem:[#allocation2 + $0x28] sm:$0xff] }
   0xf   :  { %184 = vst.msk [vmem:[#allocation4 + $0x20] sm:$0xff] %vm179_vm0, %v1670_v42  ;;  %185 = vst.msk [vmem:[#allocation4 + $0x28] sm:$0xff] %vm179_vm0, %v1670_v42  ;;  %v1835_v2 = vld [vmem:[#allocation2 + $0x30] sm:$0xff] }
  0x10   :  { %186 = vst.msk [vmem:[#allocation4 + $0x30] sm:$0xff] %vm179_vm0, %v1670_v42  ;;  %187 = vst.msk [vmem:[#allocation4 + $0x38] sm:$0xff] %vm179_vm0, %v1670_v42 }
  0x25   :  { %1597 = vset.pattern.permute.xlu1 %v1669_v38 }
  0x30   :  { %1596 = vset.pattern.permute.xlu0 %v1669_v38 }
  0x7e   :  { %v216_v8 = vpop.trf.xlu0  ;;  %v443_v9 = vpop.trf.xlu1 }
  0x7f   :  { %1552 = vmatprep.mubr.msk.f32.mxu0 %vm179_vm0, %v216_v8 }
  0x82   :  { %v217_v10 = vpop.trf.xlu0  ;;  %v444_v11 = vpop.trf.xlu1 }
  0x83   :  { %1553 = vmatmul.mubr.msk.f32.vlgmr.msra.gmra.mxu0 %vm179_vm0, %v217_v10 }
  0x84   :  { %1561 = vmatpush3.msra.mxu0 %v1500_v3  ;;  %1562 = vmatprep.mubr.msk.f32.mxu0 %vm179_vm0, %v443_v9 }
  0x85   :  { %1570 = vmatprep.subr.msk.mxu0 %vm669_vm2, %v1502_v4 }
  0x86   :  { %v330_v12 = vpop.trf.xlu0  ;;  %v556_v13 = vpop.trf.xlu1 }
  0x87   :  { %1557 = vmatprep.mubr.msk.f32.mxu1 %vm179_vm0, %v330_v12  ;;  %1563 = vmatmul.mubr.msk.f32.vlgmr.msra.gmra.mxu0 %vm179_vm0, %v444_v11  ;;  %v1503_v12 = vld [vmem:[%s1955_s2 + $0x28] sm:$0xff] }
  0x88   :  { %1571 = vmatpush3.xpose.msk.msra.mxu0 %vm669_vm2, %v1502_v4 }
  0x8a   :  { %v331_v14 = vpop.trf.xlu0  ;;  %v557_v15 = vpop.trf.xlu1 }
  0x8b   :  { %1558 = vmatmul.mubr.msk.f32.vlgmr.msra.gmra.mxu1 %vm179_vm0, %v331_v14  ;;  %v1505_v14 = vld [vmem:[%s1955_s2 + $0x58] sm:$0xff] }
  0x8c   :  { %1566 = vmatpush3.msra.mxu1 %v1501_v7  ;;  %1567 = vmatprep.mubr.msk.f32.mxu1 %vm179_vm0, %v556_v13  ;;  %v1850_v7 = vld [vmem:[#allocation2 + $0x38] sm:$0xff]  ;;  %v1504_v13 = vld [vmem:[%s1955_s2 + $0x40] sm:$0xff]  ;;  %s1671_s2 = smov [#allocation8]  }
  0x8d   :  { %1575 = vmatprep.subr.msk.mxu1 %vm669_vm2, %v1503_v12  ;;  %1580 = vmatprep.subr.msk.mxu0 %vm669_vm2, %v1504_v13  ;;  %s1475_s7 = sshll.u32 %s1671_s2, 4  ;;  %s1476_s7 = int_to_ptr.vmem [resolvable:$true] %s1475_s7 }
  0x8e   :  { %s1646_s8 = scalar_lea.vmem %s1476_s7, 512  ;;  %p1651_p1 = scmp.lt.s32.totalorder %s1476_s7, %s1476_s7 }
  0x8f   :  { %1568 = vmatmul.mubr.msk.f32.vlgmr.msra.gmra.mxu1 %vm179_vm0, %v557_v15  ;;  %p1647_p0 = scmp.ne.s32.totalorder %s1476_s7, %s1646_s8  ;;  %p1652_p2 = scmp.lt.s32.totalorder %s1646_s8, %s1646_s8 }
  0x90   :  { %1576 = vmatpush3.xpose.msk.msra.mxu1 %vm669_vm2, %v1503_v12 }
  0x91   :  { %1585 = vmatprep.subr.msk.mxu1 %vm669_vm2, %v1505_v14  ;;  %p1653_p3 = por %p1652_p2, %p1651_p1 }
  0x93   :  { %p1654_p4 = pnand %p1653_p3, %p1647_p0 }
 0x143   :  { %v1554_v17 = vpop.f32.mrf.mxu0 }
 0x144   :  { %v1734_v18 = vmul.f32 0.35355338, %v1554_v17 }
 0x145   :  { %v305_v19 = vpop.f32.mrf.mxu0 }
 0x146   :  { %v1736_v20 = vmul.f32 0.35355338, %v305_v19  ;;  %v673_v21 = vsel %vm669_vm2, %v1734_v18, -inf }
 0x147   :  { %674 = vmax.xlane.f32.xlu1 %v673_v21  ;;  %v1564_v22 = vpop.f32.mrf.mxu0 }
 0x148   :  { %v670_v23 = vsel %vm669_vm2, %v1736_v20, -inf  ;;  %v1742_v25 = vmul.f32 0.35355338, %v1564_v22 }
 0x149   :  { %671 = vmax.xlane.f32.xlu0 %v670_v23  ;;  %v531_v24 = vpop.f32.mrf.mxu0 }
 0x14a   :  { %v1744_v26 = vmul.f32 0.35355338, %v531_v24  ;;  %v685_v33 = vsel %vm669_vm2, %v1742_v25, -inf }
 0x14b   :  { %v1559_v27 = vpop.f32.mrf.mxu1 }
 0x14c   :  { %v1746_v28 = vmul.f32 0.35355338, %v1559_v27  ;;  %v682_v29 = vsel %vm669_vm2, %v1744_v26, -inf }
 0x14d   :  { %683 = vmax.xlane.f32.xlu0 %v682_v29  ;;  %v418_v30 = vpop.f32.mrf.mxu1 }
 0x14e   :  { %v1750_v31 = vmul.f32 0.35355338, %v418_v30  ;;  %v679_v32 = vsel %vm669_vm2, %v1746_v28, -inf }
 0x14f   :  { %680 = vmax.xlane.f32.xlu1 %v679_v32  ;;  %v1569_v34 = vpop.f32.mrf.mxu1 }
 0x150   :  { %v676_v36 = vsel %vm669_vm2, %v1750_v31, -inf  ;;  %v1760_v39 = vmul.f32 0.35355338, %v1569_v34 }
 0x151   :  { %686 = vmax.xlane.f32.xlu0 %v685_v33  ;;  %v644_v35 = vpop.f32.mrf.mxu1 }
 0x152   :  { %v1758_v37 = vmul.f32 0.35355338, %v644_v35  ;;  %v691_v41 = vsel %vm669_vm2, %v1760_v39, -inf }
 0x153   :  { %677 = vmax.xlane.f32.xlu1 %v676_v36 }
 0x154   :  { %v688_v40 = vsel %vm669_vm2, %v1758_v37, -inf }
 0x157   :  { %689 = vmax.xlane.f32.xlu1 %v688_v40 }
 0x15b   :  { %692 = vmax.xlane.f32.xlu1 %v691_v41 }
 0x1d0   :  { %v675_v44 = vpop.xlane.xlu1 %674 }
 0x1d1   :  { %v1787_v46 = vmax.f32 %v1782_v43, %v675_v44 }
 0x1d2   :  { %v672_v47 = vpop.xlane.xlu0 %671 }
 0x1d3   :  { %v767_v48 = vsub.f32 %v1782_v43, %v1787_v46  ;;  %848 = vst.msk [vmem:[#allocation2 + $0x8] sm:$0xff] %vm162_vm1, %v1787_v46  ;;  %v1794_v49 = vmax.f32 %v1784_v45, %v672_v47  ;;  %709 = vperm.xlu1 %1597, %v1787_v46  }
 0x1d5   :  { %v766_v51 = vsub.f32 %v1784_v45, %v1794_v49  ;;  %847 = vst.msk [vmem:[#allocation2] sm:$0xff] %vm162_vm1, %v1794_v49  ;;  %704 = vperm.xlu0 %1596, %v1794_v49  }
 0x1d6   :  { %v684_v52 = vpop.xlane.xlu0 %683 }
 0x1d7   :  { %v1807_v54 = vmax.f32 %v1797_v50, %v684_v52  ;;  %v774_v4 = vmul.f32 1.442695, %v766_v51  ;;  %v776_v51 = vmul.f32 1.442695, %v767_v48 }
 0x1d8   :  { %v681_v55 = vpop.xlane.xlu1 %680 }
 0x1d9   :  { %v770_v57 = vsub.f32 %v1797_v50, %v1807_v54  ;;  %851 = vst.msk [vmem:[#allocation2 + $0x20] sm:$0xff] %vm162_vm1, %v1807_v54  ;;  %v1816_v58 = vmax.f32 %v1804_v53, %v681_v55 }
 0x1da   :  { %v687_v59 = vpop.xlane.xlu0 %686 }
 0x1db   :  { %v769_v61 = vsub.f32 %v1804_v53, %v1816_v58  ;;  %850 = vst.msk [vmem:[#allocation2 + $0x18] sm:$0xff] %vm162_vm1, %v1816_v58  ;;  %v1825_v62 = vmax.f32 %v1809_v56, %v687_v59  ;;  %719 = vperm.xlu1 %1597, %v1816_v58   ;;  %v791_v58 = vld [vmem:[#allocation3 + $0x8] sm:$0xff] }
 0x1dc   :  { %v678_v63 = vpop.xlane.xlu1 %677 }
 0x1dd   :  { %v771_v0 = vsub.f32 %v1809_v56, %v1825_v62  ;;  %852 = vst.msk [vmem:[#allocation2 + $0x28] sm:$0xff] %vm162_vm1, %v1825_v62  ;;  %v1833_v1 = vmax.f32 %v1818_v60, %v678_v63  ;;  %v780_v46 = vmul.f32 1.442695, %v769_v61 }
 0x1df   :  { %v768_v3 = vsub.f32 %v1818_v60, %v1833_v1  ;;  %849 = vst.msk [vmem:[#allocation2 + $0x10] sm:$0xff] %vm162_vm1, %v1833_v1  ;;  %714 = vperm.xlu1 %1597, %v1833_v1  }
 0x1e0   :  { %v690_v5 = vpop.xlane.xlu1 %689 }
 0x1e1   :  { %v1847_v6 = vmax.f32 %v1835_v2, %v690_v5 }
 0x1e3   :  { %729 = vperm.xlu1 %1597, %v1825_v62   ;;  %v772_v8 = vsub.f32 %v1835_v2, %v1847_v6  ;;  %853 = vst.msk [vmem:[#allocation2 + $0x30] sm:$0xff] %vm162_vm1, %v1847_v6 }
 0x1e4   :  { %v693_v9 = vpop.xlane.xlu1 %692 }
 0x1e5   :  { %v1858_v10 = vmax.f32 %v1850_v7, %v693_v9  ;;  %v782_v9 = vmul.f32 1.442695, %v770_v57  ;;  %v786_v45 = vmul.f32 1.442695, %v772_v8  ;;  %v784_v57 = vmul.f32 1.442695, %v771_v0 }
 0x1e6   :  { %v790_v8 = vld [vmem:[#allocation3] sm:$0xff] }
 0x1e7   :  { %724 = vperm.xlu1 %1597, %v1807_v54   ;;  %v773_v11 = vsub.f32 %v1850_v7, %v1858_v10  ;;  %854 = vst.msk [vmem:[#allocation2 + $0x38] sm:$0xff] %vm162_vm1, %v1858_v10 }
 0x1e9   :  { %v788_v56 = vmul.f32 1.442695, %v773_v11  ;;  %v793_v11 = vld [vmem:[#allocation3 + $0x18] sm:$0xff] }
 0x1eb   :  { %734 = vperm.xlu1 %1597, %v1847_v6   ;;  %v778_v6 = vmul.f32 1.442695, %v768_v3 }
 0x1ef   :  { %739 = vperm.xlu1 %1597, %v1858_v10  }
 0x24e   :  { %v710_v15 = vpop.permute.xlu1 %709 }
 0x24f   :  { %v743_v16 = vsub.f32 %v1734_v18, %v710_v15 }
 0x250   :  { %v705_v17 = vpop.permute.xlu0 %704 }
 0x251   :  { %v752_v19 = vmul.f32 1.442695, %v743_v16  ;;  %v742_v21 = vsub.f32 %v1736_v20, %v705_v17 }
 0x253   :  { %1598 = vpow2.f32 %v752_v19  ;;  %v750_v22 = vmul.f32 1.442695, %v742_v21  ;;  %v792_v19 = vld [vmem:[#allocation3 + $0x10] sm:$0xff] }
 0x255   :  { %1600 = vpow2.f32 %v750_v22 }
 0x256   :  { %v720_v23 = vpop.permute.xlu1 %719 }
 0x257   :  { %v745_v24 = vsub.f32 %v1746_v28, %v720_v23 }
 0x259   :  { %v756_v27 = vmul.f32 1.442695, %v745_v24 }
 0x25a   :  { %v715_v29 = vpop.permute.xlu1 %714 }
 0x25b   :  { %1602 = vpow2.f32 %v756_v27  ;;  %v744_v30 = vsub.f32 %v1750_v31, %v715_v29  ;;  %v795_v27 = vld [vmem:[#allocation3 + $0x28] sm:$0xff] }
 0x25d   :  { %v754_v32 = vmul.f32 1.442695, %v744_v30 }
 0x25e   :  { %v730_v33 = vpop.permute.xlu1 %729 }
 0x25f   :  { %1604 = vpow2.f32 %v754_v32  ;;  %v747_v18 = vsub.f32 %v1742_v25, %v730_v33 }
 0x260   :  { %v1599_v34 = vpop.eup %1598 }
 0x261   :  { %v760_v35 = vmul.f32 1.442695, %v747_v18  ;;  %v809_v20 = vsel %vm669_vm2, %v1599_v34, 0.0  ;;  %v794_v18 = vld [vmem:[#allocation3 + $0x20] sm:$0xff] }
 0x262   :  { %v1601_v36 = vpop.eup %1600  ;;  %810 = vadd.xlane.f32.xlu1 %v809_v20  ;;  %v725_v38 = vpop.permute.xlu1 %724 }
 0x263   :  { %1606 = vpow2.f32 %v760_v35  ;;  %v746_v28 = vsub.f32 %v1744_v26, %v725_v38  ;;  %1572 = vmatprep.mubr.msk.f32.mxu0 %vm669_vm2, %v1601_v36  ;;  %v806_v40 = vsel %vm669_vm2, %v1601_v36, 0.0  ;;  %v796_v38 = vld [vmem:[#allocation3 + $0x30] sm:$0xff] }
 0x264   :  { %1573 = vmatmul.mubr.msk.f32.vlgmr.msra.gmra.mxu0 %vm669_vm2, %v1599_v34 }
 0x265   :  { %v758_v31 = vmul.f32 1.442695, %v746_v28  ;;  %1581 = vmatpush3.xpose.msk.msra.mxu0 %vm669_vm2, %v1504_v13 }
 0x266   :  { %v735_v25 = vpop.permute.xlu1 %734  ;;  %807 = vadd.xlane.f32.xlu1 %v806_v40 }
 0x267   :  { %1608 = vpow2.f32 %v758_v31  ;;  %v748_v41 = vsub.f32 %v1758_v37, %v735_v25 }
 0x268   :  { %v1603_v42 = vpop.eup %1602 }
 0x269   :  { %v762_v44 = vmul.f32 1.442695, %v748_v41  ;;  %v815_v47 = vsel %vm669_vm2, %v1603_v42, 0.0 }
 0x26a   :  { %816 = vadd.xlane.f32.xlu0 %v815_v47  ;;  %v740_v26 = vpop.permute.xlu1 %739 }
 0x26b   :  { %1610 = vpow2.f32 %v762_v44  ;;  %v749_v52 = vsub.f32 %v1760_v39, %v740_v26 }
 0x26c   :  { %v1605_v55 = vpop.eup %1604 }
 0x26d   :  { %v764_v59 = vmul.f32 1.442695, %v749_v52  ;;  %1577 = vmatprep.mubr.msk.f32.mxu1 %vm669_vm2, %v1605_v55  ;;  %v812_v63 = vsel %vm669_vm2, %v1605_v55, 0.0 }
 0x26e   :  { %1578 = vmatmul.mubr.msk.f32.vlgmr.msra.gmra.mxu1 %vm669_vm2, %v1603_v42  ;;  %813 = vadd.xlane.f32.xlu0 %v812_v63  ;;  %v797_v42 = vld [vmem:[#allocation3 + $0x38] sm:$0xff] }
 0x26f   :  { %1612 = vpow2.f32 %v764_v59  ;;  %1586 = vmatpush3.xpose.msk.msra.mxu1 %vm669_vm2, %v1505_v14 }
 0x270   :  { %v1607_v37 = vpop.eup %1606  ;;  %1614 = vpow2.f32 %v774_v4 }
 0x271   :  { %v821_v5 = vsel %vm669_vm2, %v1607_v37, 0.0  ;;  %1616 = vpow2.f32 %v782_v9 }
 0x272   :  { %822 = vadd.xlane.f32.xlu1 %v821_v5  ;;  %1618 = vpow2.f32 %v786_v45 }
 0x273   :  { %1620 = vpow2.f32 %v776_v51 }
 0x274   :  { %v1609_v39 = vpop.eup %1608  ;;  %1622 = vpow2.f32 %v784_v57 }
 0x275   :  { %1582 = vmatprep.mubr.msk.f32.mxu0 %vm669_vm2, %v1609_v39  ;;  %v818_v12 = vsel %vm669_vm2, %v1609_v39, 0.0  ;;  %1624 = vpow2.f32 %v778_v6 }
 0x276   :  { %819 = vadd.xlane.f32.xlu0 %v818_v12  ;;  %1583 = vmatmul.mubr.msk.f32.vlgmr.msra.gmra.mxu0 %vm669_vm2, %v1607_v37  ;;  %1626 = vpow2.f32 %v780_v46 }
 0x277   :  { %1628 = vpow2.f32 %v788_v56 }
 0x278   :  { %v1611_v13 = vpop.eup %1610 }
 0x279   :  { %1587 = vmatprep.mubr.msk.f32.mxu1 %vm669_vm2, %v1611_v13  ;;  %v824_v49 = vsel %vm669_vm2, %v1611_v13, 0.0 }
 0x27a   :  { %825 = vadd.xlane.f32.xlu0 %v824_v49 }
 0x27c   :  { %v1613_v50 = vpop.eup %1612 }
 0x27d   :  { %1588 = vmatmul.mubr.msk.f32.vlgmr.msra.gmra.mxu1 %vm669_vm2, %v1613_v50  ;;  %v827_v54 = vsel %vm669_vm2, %v1613_v50, 0.0  ;;  %v1615_v2 = vpop.eup %1614 }
 0x27e   :  { %828 = vadd.xlane.f32.xlu0 %v827_v54  ;;  %v1617_v43 = vpop.eup %1616  ;;  %v798_v7 = vmul.f32 %v1615_v2, %v790_v8  ;;  %v1192_v54 = vld [vmem:[#allocation4 + $0x8] sm:$0xff] }
 0x27f   :  { %v1619_v48 = vpop.eup %1618  ;;  %v802_v20 = vmul.f32 %v1617_v43, %v794_v18 }
 0x280   :  { %v1621_v62 = vpop.eup %1620  ;;  %v804_v40 = vmul.f32 %v1619_v48, %v796_v38 }
 0x281   :  { %v1623_v60 = vpop.eup %1622  ;;  %v799_v61 = vmul.f32 %v1621_v62, %v791_v58 }
 0x282   :  { %v1625_v0 = vpop.eup %1624  ;;  %v803_v32 = vmul.f32 %v1623_v60, %v795_v27 }
 0x283   :  { %1201 = vperm.xlu1 %1597, %v1615_v2   ;;  %v1627_v1 = vpop.eup %1626  ;;  %v800_v23 = vmul.f32 %v1625_v0, %v792_v19  ;;  %v1191_v2 = vld [vmem:[#allocation4] sm:$0xff] }
 0x284   :  { %v1629_v53 = vpop.eup %1628  ;;  %v801_v16 = vmul.f32 %v1627_v1, %v793_v11 }
 0x285   :  { %v805_v47 = vmul.f32 %v1629_v53, %v797_v42 }
 0x287   :  { %1221 = vperm.xlu1 %1597, %v1617_v43  }
 0x28b   :  { %1231 = vperm.xlu1 %1597, %v1619_v48  }
 0x28f   :  { %1206 = vperm.xlu1 %1597, %v1621_v62  }
 0x293   :  { %1226 = vperm.xlu1 %1597, %v1623_v60  }
 0x294   :  { %1211 = vperm.xlu0 %1596, %v1625_v0   ;;  %v1194_v0 = vld [vmem:[#allocation4 + $0x18] sm:$0xff] }
 0x298   :  { %1216 = vperm.xlu0 %1596, %v1627_v1  }
 0x29c   :  { %1236 = vperm.xlu0 %1596, %v1629_v53   ;;  %v1193_v53 = vld [vmem:[#allocation4 + $0x10] sm:$0xff] }
 0x2eb   :  { %v811_v3 = vpop.xlane.xlu1 %810 }
 0x2ec   :  { %v831_v14 = vadd.f32 %v811_v3, %v799_v61 }
 0x2ee   :  { %840 = vst.msk [vmem:[#allocation3 + $0x8] sm:$0xff] %vm162_vm1, %v831_v14 }
 0x2ef   :  { %v808_v10 = vpop.xlane.xlu1 %807 }
 0x2f0   :  { %v830_v15 = vadd.f32 %v808_v10, %v798_v7  ;;  %v1196_v10 = vld [vmem:[#allocation4 + $0x28] sm:$0xff] }
 0x2f2   :  { %839 = vst.msk [vmem:[#allocation3] sm:$0xff] %vm162_vm1, %v830_v15  ;;  %v1195_v15 = vld [vmem:[#allocation4 + $0x20] sm:$0xff] }
 0x2f3   :  { %v817_v17 = vpop.xlane.xlu0 %816 }
 0x2f4   :  { %v833_v21 = vadd.f32 %v817_v17, %v801_v16 }
 0x2f5   :  { %v1267_v22 = vld [vmem:[#allocation3 + $0x8] sm:$0xff] }
 0x2f6   :  { %842 = vst.msk [vmem:[#allocation3 + $0x18] sm:$0xff] %vm162_vm1, %v833_v21  ;;  %1630 = vrcp.f32 %v1267_v22 }
 0x2f7   :  { %v814_v24 = vpop.xlane.xlu0 %813 }
 0x2f8   :  { %v832_v29 = vadd.f32 %v814_v24, %v800_v23  ;;  %v1198_v23 = vld [vmem:[#allocation4 + $0x38] sm:$0xff] }
 0x2f9   :  { %v1266_v30 = vld [vmem:[#allocation3] sm:$0xff] }
 0x2fa   :  { %841 = vst.msk [vmem:[#allocation3 + $0x10] sm:$0xff] %vm162_vm1, %v832_v29  ;;  %1632 = vrcp.f32 %v1266_v30  ;;  %v1197_v29 = vld [vmem:[#allocation4 + $0x30] sm:$0xff] }
 0x2fb   :  { %v823_v33 = vpop.xlane.xlu1 %822 }
 0x2fc   :  { %v835_v34 = vadd.f32 %v823_v33, %v803_v32 }
 0x2fd   :  { %v1269_v35 = vld [vmem:[#allocation3 + $0x18] sm:$0xff] }
 0x2fe   :  { %844 = vst.msk [vmem:[#allocation3 + $0x28] sm:$0xff] %vm162_vm1, %v835_v34  ;;  %1634 = vrcp.f32 %v1269_v35 }
 0x2ff   :  { %v820_v36 = vpop.xlane.xlu0 %819  ;;  %v1202_v5 = vpop.permute.xlu1 %1201 }
 0x300   :  { %v834_v28 = vadd.f32 %v820_v36, %v802_v20  ;;  %v1239_v48 = vmul.f32 %v1202_v5, %v1191_v2 }
 0x301   :  { %v1268_v31 = vld [vmem:[#allocation3 + $0x10] sm:$0xff] }
 0x302   :  { %843 = vst.msk [vmem:[#allocation3 + $0x20] sm:$0xff] %vm162_vm1, %v834_v28  ;;  %1636 = vrcp.f32 %v1268_v31 }
 0x303   :  { %v1631_v25 = vpop.eup %1630  ;;  %v826_v41 = vpop.xlane.xlu0 %825 }
 0x304   :  { %v836_v44 = vadd.f32 %v826_v41, %v804_v40  ;;  %1297 = vperm.xlu1 %1597, %v1631_v25   ;;  %v1222_v12 = vpop.permute.xlu1 %1221 }
 0x305   :  { %v1271_v63 = vld [vmem:[#allocation3 + $0x28] sm:$0xff]  ;;  %v1243_v19 = vmul.f32 %v1222_v12, %v1195_v15 }
 0x306   :  { %845 = vst.msk [vmem:[#allocation3 + $0x30] sm:$0xff] %vm162_vm1, %v836_v44 }
 0x307   :  { %v1633_v26 = vpop.eup %1632  ;;  %v829_v52 = vpop.xlane.xlu0 %828 }
 0x308   :  { %v837_v55 = vadd.f32 %v829_v52, %v805_v47  ;;  %1292 = vperm.xlu1 %1597, %v1633_v26   ;;  %v1232_v49 = vpop.permute.xlu1 %1231 }
 0x309   :  { %v1270_v59 = vld [vmem:[#allocation3 + $0x20] sm:$0xff]  ;;  %v1245_v33 = vmul.f32 %v1232_v49, %v1197_v29 }
 0x30a   :  { %846 = vst.msk [vmem:[#allocation3 + $0x38] sm:$0xff] %vm162_vm1, %v837_v55  ;;  %1638 = vrcp.f32 %v1270_v59 }
 0x30b   :  { %v1635_v37 = vpop.eup %1634  ;;  %1640 = vrcp.f32 %v1271_v63 }
 0x30c   :  { %1307 = vperm.xlu0 %1596, %v1635_v37   ;;  %v1207_v57 = vpop.permute.xlu1 %1206 }
 0x30d   :  { %v1272_v4 = vld [vmem:[#allocation3 + $0x30] sm:$0xff]  ;;  %v1240_v6 = vmul.f32 %v1207_v57, %v1192_v54 }
 0x30e   :  { %1642 = vrcp.f32 %v1272_v4 }
 0x30f   :  { %v1637_v39 = vpop.eup %1636  ;;  %v1212_v43 = vpop.permute.xlu0 %1211 }
 0x310   :  { %1302 = vperm.xlu0 %1596, %v1637_v39   ;;  %v1241_v3 = vmul.f32 %v1212_v43, %v1193_v53  ;;  %v1227_v11 = vpop.permute.xlu1 %1226 }
 0x311   :  { %v1273_v9 = vld [vmem:[#allocation3 + $0x38] sm:$0xff]  ;;  %v1244_v16 = vmul.f32 %v1227_v11, %v1196_v10 }
 0x312   :  { %1644 = vrcp.f32 %v1273_v9 }
 0x313   :  { %v1217_v1 = vpop.permute.xlu0 %1216 }
 0x314   :  { %v1242_v58 = vmul.f32 %v1217_v1, %v1194_v0 }
 0x317   :  { %v1639_v13 = vpop.eup %1638  ;;  %v1237_v24 = vpop.permute.xlu0 %1236 }
 0x318   :  { %1312 = vperm.xlu1 %1597, %v1639_v13   ;;  %v1641_v45 = vpop.eup %1640  ;;  %v1246_v30 = vmul.f32 %v1237_v24, %v1198_v23 }
 0x31b   :  { %v1643_v50 = vpop.eup %1642 }
 0x31c   :  { %1317 = vperm.xlu1 %1597, %v1641_v45   ;;  %1322 = vperm.xlu0 %1596, %v1643_v50  }
 0x31f   :  { %v1645_v51 = vpop.eup %1644 }
 0x320   :  { %1327 = vperm.xlu0 %1596, %v1645_v51  }
 0x324   :  { %v1574_v46 = vpop.f32.mrf.mxu0 }
 0x325   :  { %v1248_v56 = vadd.f32 %v1574_v46, %v1240_v6 }
 0x326   :  { %v930_v62 = vpop.f32.mrf.mxu0 }
 0x327   :  { %1256 = vst.msk [vmem:[#allocation4 + $0x8] sm:$0xff] %vm179_vm0, %v1248_v56  ;;  %v1247_v60 = vadd.f32 %v1239_v48, %v930_v62 }
 0x329   :  { %1255 = vst.msk [vmem:[#allocation4] sm:$0xff] %vm179_vm0, %v1247_v60 }
 0x32e   :  { %v1579_v61 = vpop.f32.mrf.mxu1  ;;  %v1283_v31 = vld [vmem:[#allocation4 + $0x8] sm:$0xff] }
 0x32f   :  { %v1250_v8 = vadd.f32 %v1579_v61, %v1242_v58 }
 0x330   :  { %v1014_v14 = vpop.f32.mrf.mxu1  ;;  %v1282_v36 = vld [vmem:[#allocation4] sm:$0xff] }
 0x331   :  { %1258 = vst.msk [vmem:[#allocation4 + $0x18] sm:$0xff] %vm179_vm0, %v1250_v8  ;;  %v1249_v7 = vadd.f32 %v1241_v3, %v1014_v14 }
 0x333   :  { %1257 = vst.msk [vmem:[#allocation4 + $0x10] sm:$0xff] %vm179_vm0, %v1249_v7 }
 0x336   :  { %v1584_v17 = vpop.f32.mrf.mxu0 }
 0x337   :  { %v1252_v21 = vadd.f32 %v1584_v17, %v1244_v16 }
 0x338   :  { %v1098_v22 = vpop.f32.mrf.mxu0  ;;  %v1285_v47 = vld [vmem:[#allocation4 + $0x18] sm:$0xff] }
 0x339   :  { %1260 = vst.msk [vmem:[#allocation4 + $0x28] sm:$0xff] %vm179_vm0, %v1252_v21  ;;  %v1251_v27 = vadd.f32 %v1243_v19, %v1098_v22 }
 0x33a   :  { %v1284_v41 = vld [vmem:[#allocation4 + $0x10] sm:$0xff] }
 0x33b   :  { %1259 = vst.msk [vmem:[#allocation4 + $0x20] sm:$0xff] %vm179_vm0, %v1251_v27 }
 0x33d   :  { %v1589_v32 = vpop.f32.mrf.mxu1 }
 0x33e   :  { %v1254_v18 = vadd.f32 %v1589_v32, %v1246_v30 }
 0x33f   :  { %v1182_v34 = vpop.f32.mrf.mxu1 }
 0x340   :  { %1262 = vst.msk [vmem:[#allocation4 + $0x38] sm:$0xff] %vm179_vm0, %v1254_v18  ;;  %v1253_v35 = vadd.f32 %v1245_v33, %v1182_v34  ;;  %v1287_v63 = vld [vmem:[#allocation4 + $0x28] sm:$0xff] }
 0x342   :  { %1261 = vst.msk [vmem:[#allocation4 + $0x30] sm:$0xff] %vm179_vm0, %v1253_v35  ;;  %v1286_v52 = vld [vmem:[#allocation4 + $0x20] sm:$0xff] }
 0x347   :  { %v1289_v13 = vld [vmem:[#allocation4 + $0x38] sm:$0xff] }
 0x349   :  { %v1288_v39 = vld [vmem:[#allocation4 + $0x30] sm:$0xff] }
 0x37f   :  { %v1298_v20 = vpop.permute.xlu1 %1297 }
 0x380   :  { %v1331_v25 = vmul.f32 %v1298_v20, %v1283_v31 }
 0x383   :  { %v1293_v38 = vpop.permute.xlu1 %1292 }
 0x384   :  { %v1330_v28 = vmul.f32 %v1293_v38, %v1282_v36 }
 0x386   :  { %1338 = vxpose.xlu1.b32.start [1/2] (short) (narrow) %v1330_v28, 8 }
 0x387   :  { %v1308_v40 = vpop.permute.xlu0 %1307 }
 0x388   :  { %v1333_v26 = vmul.f32 %v1308_v40, %v1285_v47 }
 0x38a   :  { %1339 = vxpose.xlu1.b32.end [2/2] (short) (narrow) %v1331_v25, 8 }
 0x38b   :  { %v1303_v42 = vpop.permute.xlu0 %1302 }
 0x38c   :  { %v1332_v44 = vmul.f32 %v1303_v42, %v1284_v41 }
 0x38e   :  { %1370 = vxpose.xlu0.b32.start [1/2] (short) (narrow) %v1332_v44, 8 }
 0x392   :  { %1371 = vxpose.xlu0.b32.end [2/2] (short) (narrow) %v1333_v26, 8 }
 0x393   :  { %v1313_v55 = vpop.permute.xlu1 %1312 }
 0x394   :  { %v1334_v59 = vmul.f32 %v1313_v55, %v1286_v52 }
 0x396   :  { %1402 = vxpose.xlu0.b32.start [1/2] (short) (narrow) %v1334_v59, 8 }
 0x397   :  { %v1318_v37 = vpop.permute.xlu1 %1317  ;;  %v1323_v4 = vpop.permute.xlu0 %1322 }
 0x398   :  { %v1335_v5 = vmul.f32 %v1318_v37, %v1287_v63  ;;  %v1336_v9 = vmul.f32 %v1323_v4, %v1288_v39 }
 0x39a   :  { %1403 = vxpose.xlu0.b32.end [2/2] (short) (narrow) %v1335_v5, 8 }
 0x39b   :  { %v1328_v12 = vpop.permute.xlu0 %1327 }
 0x39c   :  { %v1337_v45 = vmul.f32 %v1328_v12, %v1289_v13 }
 0x39e   :  { %1434 = vxpose.xlu0.b32.start [1/2] (short) (narrow) %v1336_v9, 8 }
 0x3a2   :  { %1435 = vxpose.xlu0.b32.end [2/2] (short) (narrow) %v1337_v45, 8 }
 0x402   :  { %v1354_v49 = vpop.trf.xlu1 }
 0x403   :  { %1466 = vst.msk [vmem:[#allocation8] sm:$0xff] %vm669_vm2, %v1354_v49 }
 0x40a   :  { %v1386_v50 = vpop.trf.xlu0 }
 0x40b   :  { %1467 = vst.msk [vmem:[#allocation8 + $0x8] sm:$0xff] %vm669_vm2, %v1386_v50 }
 0x412   :  { %v1418_v51 = vpop.trf.xlu0 }
 0x413   :  { %1468 = vst.msk [vmem:[#allocation8 + $0x10] sm:$0xff] %vm669_vm2, %v1418_v51 }
 0x41a   :  { %v1450_v54 = vpop.trf.xlu0 }
 0x41b   :  { %1469 = vst.msk [vmem:[#allocation8 + $0x18] sm:$0xff] %vm669_vm2, %v1450_v54 }
 0x41c   :  { %1657 = shalt.err (!%p1654_p4)
}
 0x41d   :  { %s1672_s9 = smov 128   ;;  %s1673_s10 = smov 8  }
 0x41e   :  { %1481 = dma.vmem_to_hbm [thread:$0]  %s1476_s7, 512, %s1956_s3, [#allocation9], %s1672_s9, %s1672_s9, %s1673_s10  }
 0x41f   :  { %1666 = dma.done.wait [#allocation9], 512  }
 0x420   :  { %1667 = vsyncadd [#allocation9], 4294966784 }
 0x421   :  { %1485 = vsyncpa [#allocation9], 1 }

</bundles_post_ra>
